<compile_context>
chip_gen: v7x
topology: tpu7x:2x2x1
jax: 0.10.0
libtpu: 0.0.40
codegen_flags: <defaults>
</compile_context>

<pallas_src>
import jax
import jax.numpy as jnp
from jax.experimental import pallas as pl
from jax.experimental.pallas import tpu as pltpu

LN_EPS = 1e-5


def sgu_kernel(x_ref, w_ref, b_ref, gamma_ref, beta_ref, o_ref, gslab_ref):
    # x_ref:     (BB, N, 2*D)  -- res | gate concatenated on the last dim
    # w_ref:     (N, N)        -- Conv1d(kernel_size=1) weight over the seq axis (f32)
    # b_ref:     (N, 1)        -- Conv1d bias
    # gamma_ref: (1, D), beta_ref: (1, D)   -- LayerNorm affine params
    # o_ref:     (BB, N, D)
    # gslab_ref: (N, BB*D) f32 scratch -- normalized gate with the batch folded
    #            into the lane axis, feeding one 2-D MXU matmul.
    BB, N, D = o_ref.shape
    gamma = gamma_ref[...]
    beta = beta_ref[...]

    # Pass 1: per-batch-item LayerNorm (f32) over the feature (lane) axis,
    # packed into the slab at lane offset b*D.  Static unroll keeps every
    # slice offset static (safe for any D, aligned or not) and the per-item
    # live set down to a single (N, 2D) row block.
    for b in range(BB):
        xb = x_ref[b]                                    # (N, 2D)
        gate = xb[:, D:].astype(jnp.float32)             # (N, D)
        mean = jnp.mean(gate, axis=-1, keepdims=True)
        cent = gate - mean
        var = jnp.mean(cent * cent, axis=-1, keepdims=True)
        inv = jax.lax.rsqrt(var + LN_EPS)
        gslab_ref[:, b * D:(b + 1) * D] = cent * inv * gamma + beta

    # Conv1d(kernel_size=1) over the seq axis for the WHOLE batch block as ONE
    # 2-D matmul: W (N, N) @ G (N, BB*D), f32 accumulation on the MXU.  No
    # broadcast copies of W, no batched einsum of tiny per-item matmuls.
    proj = jnp.dot(w_ref[...], gslab_ref[...],
                   preferred_element_type=jnp.float32) + b_ref[...]

    # Pass 2: spatial gating (act = Identity).  res is deferred: re-read from
    # the VMEM x block here rather than kept live across the LN + matmul.
    for b in range(BB):
        res = x_ref[b][:, :D].astype(jnp.float32)        # (N, D)
        o_ref[b] = (proj[:, b * D:(b + 1) * D] * res).astype(o_ref.dtype)


def _vmem_capacity_bytes():
    """Physical VMEM of this generation (128 MiB v5e/v6e, 64 MiB/TC v7x)."""
    try:
        return int(pltpu.get_tpu_info().vmem_capacity_bytes)
    except Exception:
        return 64 * 1024 * 1024   # conservative (v7x-sized) fallback


def _pick_batch_block(B, N, D, vmem_capacity):
    """Batch items per grid step, sized against this generation's VMEM."""
    # ~1/4 of physical VMEM for the pipelined working set (32 MiB on v5e/v6e,
    # 16 MiB on v7x); leaves headroom for compiler scratch and slack.
    budget = vmem_capacity // 4
    # Resident params are double-buffered by the pipeline (constant index map
    # -> DMA'd only once, but two buffers exist); charge them to the budget.
    budget -= 2 * (N * N + N + 2 * D) * 4
    budget = max(budget, 1 << 16)
    # Per batch item (f32 bytes live in VMEM):
    #   x block  (N, 2D) double-buffered : 16*N*D
    #   out block (N, D) double-buffered :  8*N*D
    #   gate-slab column + live proj col :  8*N*D
    # (per-item LayerNorm temporaries are transient, covered by the headroom.)
    per_item = 32 * N * D
    bb = max(1, min(B, budget // max(per_item, 1)))
    # Keep >= 2 grid steps whenever B >= 2: enables DMA/compute overlap on all
    # generations and lets megacore / v7x's two TensorCores shard the
    # "parallel" batch axis.
    if B >= 2:
        bb = min(bb, pl.cdiv(B, 2))
    return int(bb)


def spatial_gating_unit(x, w, b, gamma, beta, *, batch_block=None):
    """x: (B, N, dim); w: (N, N); b: (N,); gamma/beta: (D,) with D = dim // 2."""
    B, N, dim = x.shape
    D = dim // 2
    vmem_cap = _vmem_capacity_bytes()
    BB = batch_block if batch_block is not None else _pick_batch_block(B, N, D, vmem_cap)
    BB = int(max(1, min(BB, B)))

    # Pad batch so the grid tiles exactly (no padding at the demo shapes).
    Bp = pl.cdiv(B, BB) * BB
    if Bp != B:
        x = jnp.pad(x, ((0, Bp - B), (0, 0), (0, 0)))

    w32 = w.astype(jnp.float32)          # f32 matmul operand (see header note)
    b2 = b.reshape(N, 1).astype(jnp.float32)
    gamma2 = gamma.reshape(1, D).astype(jnp.float32)
    beta2 = beta.reshape(1, D).astype(jnp.float32)

    out = pl.pallas_call(
        sgu_kernel,
        out_shape=jax.ShapeDtypeStruct((Bp, N, D), x.dtype),
        grid_spec=pltpu.PrefetchScalarGridSpec(
            num_scalar_prefetch=0,
            grid=(Bp // BB,),
            in_specs=[
                # x is passed whole and chunked into res|gate inside the
                # kernel: a BlockSpec-level last-dim chunk would only be
                # lane-aligned when D % 128 == 0.
                pl.BlockSpec((BB, N, dim), lambda bi: (bi, 0, 0)),
                # Constant index maps -> DMA'd once, resident across steps.
                pl.BlockSpec((N, N), lambda bi: (0, 0)),   # conv weight
                pl.BlockSpec((N, 1), lambda bi: (0, 0)),   # conv bias
                pl.BlockSpec((1, D), lambda bi: (0, 0)),   # LN gamma
                pl.BlockSpec((1, D), lambda bi: (0, 0)),   # LN beta
            ],
            out_specs=pl.BlockSpec((BB, N, D), lambda bi: (bi, 0, 0)),
            scratch_shapes=[pltpu.VMEM((N, BB * D), jnp.float32)],
        ),
        compiler_params=pltpu.CompilerParams(
            dimension_semantics=("parallel",),
            # ~3/4 of physical VMEM: 96 MiB on v5e/v6e (128 MiB physical),
            # 48 MiB on v7x (64 MiB per TensorCore).
            vmem_limit_bytes=int(min(vmem_cap * 3 // 4, 96 * 1024 * 1024)),
        ),
    )(x, w32, b2, gamma2, beta2)
    return out[:B] if Bp != B else out


def reference_sgu(x, w, b, gamma, beta):
    """Pure-JAX reference mirroring the PyTorch forward (all f32)."""
    D = x.shape[-1] // 2
    res, gate = x[..., :D], x[..., D:]
    mean = jnp.mean(gate, axis=-1, keepdims=True)
    var = jnp.mean((gate - mean) ** 2, axis=-1, keepdims=True)
    gate = (gate - mean) / jnp.sqrt(var + LN_EPS) * gamma + beta
    gate = jnp.einsum("ij,bjd->bid", w, gate) + b[None, :, None]
    return gate * res


if __name__ == "__main__":
    # Small shapes consistent with the module's forward.
    B = 2          # batch
    dim_seq = 8    # N: Conv1d channels (gMLP "spatial"/seq length)
    dim = 32       # feature dim before chunk; D = dim // 2 = 16
    D = dim // 2

    key = jax.random.PRNGKey(0)
    kx, kw = jax.random.split(key)

    x = jax.random.normal(kx, (B, dim_seq, dim), dtype=jnp.float32)

    # Deterministic init matching the module's __init__:
    #   proj.weight ~ U(-init_eps, init_eps), init_eps = 0.001 / dim_seq
    #   proj.bias = 1.0; LayerNorm gamma = 1, beta = 0.
    init_eps = 0.001 / dim_seq
    w = jax.random.uniform(kw, (dim_seq, dim_seq), dtype=jnp.float32,
                           minval=-init_eps, maxval=init_eps)
    b = jnp.ones((dim_seq,), dtype=jnp.float32)
    gamma = jnp.ones((D,), dtype=jnp.float32)
    beta = jnp.zeros((D,), dtype=jnp.float32)

    out = jax.block_until_ready(spatial_gating_unit(x, w, b, gamma, beta))
    ref = reference_sgu(x, w, b, gamma, beta)

    assert out.shape == (B, dim_seq, D)
    # f32 matmul operands (see header): tolerance tightened vs. the previous
    # bf16-operand version.
    assert jnp.allclose(out, ref, atol=1e-4, rtol=1e-4), \
        f"max abs err {float(jnp.max(jnp.abs(out - ref)))}"

    print("KERNEL_OK")
</pallas_src>

<mosaic_0001>
module attributes {stable_mosaic.version = 11 : i64} {
  func.func @sgu_kernel(%arg0: i32, %arg1: memref<1x8x32xf32, #tpu.memory_space<vmem>>, %arg2: memref<8x8xf32, #tpu.memory_space<vmem>>, %arg3: memref<8x1xf32, #tpu.memory_space<vmem>>, %arg4: memref<1x16xf32, #tpu.memory_space<vmem>>, %arg5: memref<1x16xf32, #tpu.memory_space<vmem>>, %arg6: memref<1x8x16xf32, #tpu.memory_space<vmem>>, %arg7: memref<8x16xf32, #tpu.memory_space<vmem>>) attributes {dimension_semantics = [#tpu.dimension_semantics<parallel>], iteration_bounds = array<i64: 2>, scalar_prefetch = 0 : i64, scratch_operands = 1 : i64, tpu.core_type = #tpu.core_type<tc>, window_params = [{transform_indices = @transform_0, window_bounds = array<i64: 1, 8, 32>}, {pipeline_mode = #tpu.pipeline_mode<synchronous>, transform_indices = @transform_1, window_bounds = array<i64: 8, 8>}, {pipeline_mode = #tpu.pipeline_mode<synchronous>, transform_indices = @transform_2, window_bounds = array<i64: 8, 1>}, {pipeline_mode = #tpu.pipeline_mode<synchronous>, transform_indices = @transform_3, window_bounds = array<i64: 1, 16>}, {pipeline_mode = #tpu.pipeline_mode<synchronous>, transform_indices = @transform_4, window_bounds = array<i64: 1, 16>}, {transform_indices = @transform_5, window_bounds = array<i64: 1, 8, 16>}]} {
    %c0 = arith.constant 0 : index
    %c0_0 = arith.constant 0 : index
    %0 = vector.load %arg4[%c0, %c0_0] : memref<1x16xf32, #tpu.memory_space<vmem>>, vector<1x16xf32>
    %c0_1 = arith.constant 0 : index
    %c0_2 = arith.constant 0 : index
    %1 = vector.load %arg5[%c0_1, %c0_2] : memref<1x16xf32, #tpu.memory_space<vmem>>, vector<1x16xf32>
    %c0_3 = arith.constant 0 : index
    %c0_4 = arith.constant 0 : index
    %c0_5 = arith.constant 0 : index
    %2 = vector.load %arg1[%c0_3, %c0_4, %c0_5] : memref<1x8x32xf32, #tpu.memory_space<vmem>>, vector<1x8x32xf32>
    %3 = vector.shape_cast %2 : vector<1x8x32xf32> to vector<8x32xf32>
    %4 = vector.extract_strided_slice %3 {offsets = [0, 16], sizes = [8, 16], strides = [1, 1]} : vector<8x32xf32> to vector<8x16xf32>
    %cst = arith.constant dense<0.000000e+00> : vector<8xf32>
    %5 = vector.multi_reduction <add>, %4, %cst [1] : vector<8x16xf32> to vector<8xf32>
    %6 = vector.shape_cast %5 : vector<8xf32> to vector<8x1xf32>
    %cst_6 = arith.constant 1.600000e+01 : f32
    %7 = vector.broadcast %cst_6 : f32 to vector<8x1xf32>
    %8 = arith.divf %6, %7 : vector<8x1xf32>
    %9 = vector.broadcast %8 : vector<8x1xf32> to vector<8x16xf32>
    %10 = arith.subf %4, %9 : vector<8x16xf32>
    %11 = arith.mulf %10, %10 : vector<8x16xf32>
    %cst_7 = arith.constant dense<0.000000e+00> : vector<8xf32>
    %12 = vector.multi_reduction <add>, %11, %cst_7 [1] : vector<8x16xf32> to vector<8xf32>
    %13 = vector.shape_cast %12 : vector<8xf32> to vector<8x1xf32>
    %cst_8 = arith.constant 1.600000e+01 : f32
    %14 = vector.broadcast %cst_8 : f32 to vector<8x1xf32>
    %15 = arith.divf %13, %14 : vector<8x1xf32>
    %cst_9 = arith.constant 9.99999974E-6 : f32
    %16 = vector.broadcast %cst_9 : f32 to vector<8x1xf32>
    %17 = arith.addf %15, %16 : vector<8x1xf32>
    %18 = math.rsqrt %17 : vector<8x1xf32>
    %19 = vector.broadcast %18 : vector<8x1xf32> to vector<8x16xf32>
    %20 = arith.mulf %10, %19 : vector<8x16xf32>
    %21 = vector.broadcast %0 : vector<1x16xf32> to vector<8x16xf32>
    %22 = arith.mulf %20, %21 : vector<8x16xf32>
    %23 = vector.broadcast %1 : vector<1x16xf32> to vector<8x16xf32>
    %24 = arith.addf %22, %23 : vector<8x16xf32>
    %c0_10 = arith.constant 0 : index
    %c0_11 = arith.constant 0 : index
    %25 = vector.load %arg7[%c0_10, %c0_11] : memref<8x16xf32, #tpu.memory_space<vmem>>, vector<8x16xf32>
    tpu.vector_store %arg7[%c0_10, %c0_11], %24 {strides = array<i32>} : memref<8x16xf32, #tpu.memory_space<vmem>>, vector<8x16xf32>,
    %c0_12 = arith.constant 0 : index
    %c0_13 = arith.constant 0 : index
    %26 = vector.load %arg2[%c0_12, %c0_13] : memref<8x8xf32, #tpu.memory_space<vmem>>, vector<8x8xf32>
    %c0_14 = arith.constant 0 : index
    %c0_15 = arith.constant 0 : index
    %27 = vector.load %arg7[%c0_14, %c0_15] : memref<8x16xf32, #tpu.memory_space<vmem>>, vector<8x16xf32>
    %cst_16 = arith.constant dense<0.000000e+00> : vector<8x16xf32>
    %28 = tpu.matmul %26, %27, %cst_16 {dimension_numbers = #tpu.dot_dimension_numbers<[1], [0], [0], [1], [0, 0, 1, 1], [], []>} : vector<8x8xf32>, vector<8x16xf32>, vector<8x16xf32> -> vector<8x16xf32>
    %c0_17 = arith.constant 0 : index
    %c0_18 = arith.constant 0 : index
    %29 = vector.load %arg3[%c0_17, %c0_18] : memref<8x1xf32, #tpu.memory_space<vmem>>, vector<8x1xf32>
    %30 = vector.broadcast %29 : vector<8x1xf32> to vector<8x16xf32>
    %31 = arith.addf %28, %30 : vector<8x16xf32>
    %c0_19 = arith.constant 0 : index
    %c0_20 = arith.constant 0 : index
    %c0_21 = arith.constant 0 : index
    %32 = vector.load %arg1[%c0_19, %c0_20, %c0_21] : memref<1x8x32xf32, #tpu.memory_space<vmem>>, vector<1x8x32xf32>
    %33 = vector.shape_cast %32 : vector<1x8x32xf32> to vector<8x32xf32>
    %34 = vector.extract_strided_slice %33 {offsets = [0, 0], sizes = [8, 16], strides = [1, 1]} : vector<8x32xf32> to vector<8x16xf32>
    %35 = arith.mulf %31, %34 : vector<8x16xf32>
    %c0_22 = arith.constant 0 : index
    %c0_23 = arith.constant 0 : index
    %c0_24 = arith.constant 0 : index
    %36 = vector.load %arg6[%c0_22, %c0_23, %c0_24] : memref<1x8x16xf32, #tpu.memory_space<vmem>>, vector<1x8x16xf32>
    %37 = vector.shape_cast %36 : vector<1x8x16xf32> to vector<8x16xf32>
    %38 = vector.shape_cast %35 : vector<8x16xf32> to vector<1x8x16xf32>
    tpu.vector_store %arg6[%c0_22, %c0_23, %c0_24], %38 {strides = array<i32>} : memref<1x8x16xf32, #tpu.memory_space<vmem>>, vector<1x8x16xf32>,
    return
  }
  func.func @transform_0(%arg0: i32) -> (i32, i32, i32) {
    %c0_i32 = arith.constant 0 : i32
    %c0_i32_0 = arith.constant 0 : i32
    %c0_i32_1 = arith.constant 0 : i32
    return %arg0, %c0_i32, %c0_i32_0 : i32, i32, i32
  }
  func.func @transform_1(%arg0: i32) -> (i32, i32) {
    %c0_i32 = arith.constant 0 : i32
    %c0_i32_0 = arith.constant 0 : i32
    %c0_i32_1 = arith.constant 0 : i32
    return %c0_i32, %c0_i32_0 : i32, i32
  }
  func.func @transform_2(%arg0: i32) -> (i32, i32) {
    %c0_i32 = arith.constant 0 : i32
    %c0_i32_0 = arith.constant 0 : i32
    %c0_i32_1 = arith.constant 0 : i32
    return %c0_i32, %c0_i32_0 : i32, i32
  }
  func.func @transform_3(%arg0: i32) -> (i32, i32) {
    %c0_i32 = arith.constant 0 : i32
    %c0_i32_0 = arith.constant 0 : i32
    %c0_i32_1 = arith.constant 0 : i32
    return %c0_i32, %c0_i32_0 : i32, i32
  }
  func.func @transform_4(%arg0: i32) -> (i32, i32) {
    %c0_i32 = arith.constant 0 : i32
    %c0_i32_0 = arith.constant 0 : i32
    %c0_i32_1 = arith.constant 0 : i32
    return %c0_i32, %c0_i32_0 : i32, i32
  }
  func.func @transform_5(%arg0: i32) -> (i32, i32, i32) {
    %c0_i32 = arith.constant 0 : i32
    %c0_i32_0 = arith.constant 0 : i32
    %c0_i32_1 = arith.constant 0 : i32
    return %arg0, %c0_i32, %c0_i32_0 : i32, i32, i32
  }
}

</mosaic_0001>

<bundles_post_ra>
// kernel: tpu_custom_call.1
= control target key start
LH: loop header
LB: loop body
LE: loop exit
PB: predicated region body
PF: predicated region fallthrough
CT: control target
= control target key end

     0   :  { %10 = vsyncpa [#allocation4], 0  ;;  %s854_s0 = inlined_call_operand.hbm [shape: f32[2,8,32], index: 0, kind: input, shape index: {}]   ;;  %s855_s1 = inlined_call_operand.vmem [shape: f32[8,8], index: 1, kind: input, shape index: {}]   ;;  %s856_s2 = inlined_call_operand.vmem [shape: f32[8,1], index: 2, kind: input, shape index: {}]   ;;  %s857_s3 = inlined_call_operand.vmem [shape: f32[1,16], index: 3, kind: input, shape index: {}]   ;;  %s858_s4 = inlined_call_operand.vmem [shape: f32[1,16], index: 4, kind: input, shape index: {}]   ;;  %s859_s5 = inlined_call_operand.hbm [shape: f32[2,8,16], index: 5, kind: output, shape index: {}]  }
   0x1   :  { %12 = vsyncpa [#allocation4 + $0x1], 0 }
   0x2   :  { %13 = vsyncpa [#allocation5], 0 }
   0x3   :  { %15 = vsyncpa [#allocation5 + $0x1], 0  ;;  %s670_s18 = smov 0   ;;  %s672_s19 = smov 0  }
   0x4   :  { %s674_s20 = smov 0   ;;  %s676_s21 = smov 0  }
   0x5 LB: > { %s691_s22 = sadd.s32 4294967295, %s631_s21   ;;  %s458_s23 = sadd.s32 4294967294, %s631_s21   ;;  %s631_s21 = sphi %s676_s21, %s874_s21   ;;  %s627_s20 = sphi %s674_s20, %s873_s20   ;;  %s623_s19 = sphi %s672_s19, %s872_s19   ;;  %s619_s18 = sphi %s670_s18, %s871_s18  }
   0x6   : > { %s695_s24 = sadd.s32 1, %s631_s21   ;;  %s28_s25 = sadd.s32 1, %s627_s20 }
   0x7   : > { %s25_s26 = ssub.s32 %s631_s21, %s695_s24  ;;  %p35_p0 = scmp.ne.s32.totalorder %s627_s20, %s623_s19 }
   0x8   : > { %p26_p1 = scmp.eq.s32.totalorder %s25_s26, 0  ;;  %p36_p2 = scmp.eq.s32.totalorder %s631_s21, 0 }
   0x9   : > { %p41_p3 = scmp.ne.s32.totalorder %s623_s19, %s619_s18  ;;  %p42_p4 = scmp.eq.s32.totalorder %s691_s22, 0 }
   0xa   : > { %s707_s27 = scalar_select %p26_p1, %s627_s20, %s28_s25  }
   0xb   : > { %p709_p5 = por %p36_p2, %p35_p0  ;;  %p713_p6 = por %p42_p4, %p41_p3 }
   0xc   : > { %p149_p7 = scmp.eq.s32.totalorder %s691_s22, 1  ;;  %p155_p8 = scmp.eq.s32.totalorder %s458_s23, 1 }
   0xd   : > { %p492_p10 = scmp.lt.s32.totalorder %s631_s21, 2  ;;  %s187_s7 = sand.u32 1, %s627_s20  }
   0xe   : > { %p720_p11 = por %p149_p7, %p35_p0  ;;  %p724_p12 = por %p155_p8, %p41_p3 }
   0xf   : > { %s462_s8 = sshll.u32 %s631_s21, 7  ;;  %s461_s9 = sshll.u32 %s187_s7, 3 }
  0x10   : > { %s863_s30 = scalar_select %p720_p11, 1, 0 }
  0x11   : > { %s864_s6 = scalar_select %p724_p12, 1, 0 }
  0x12   : > { %s733_s12 = scalar_lea.hbm %s854_s0, %s462_s8  ;;  %s191_s13 = scalar_lea.vmem [#allocation3], %s461_s9 }
  0x13   : > { %s198_s14 = sshll.u32 %s191_s13, 4  ;;  %p737_p13 = pnand %p492_p10, %p709_p5  ;;  %s741_s14 = int_to_ptr.vmem [resolvable:$true] %s198_s14 }
  0x14   : > { %s188_s16 = scalar_lea.sflag [#allocation4], %s187_s7  ;;  %s535_s17 = scalar_lea.hbm %s733_s12, 128 }
  0x15   : > { %p536_p2 = scmp.ne.s32.totalorder %s733_s12, %s535_s17  ;;  %p537_p3 = pneg %p737_p13 }
  0x16   : > { %s540_s26 = scalar_lea.hbm %s854_s0, 256  ;;  %p541_p5 = scmp.lt.u32.totalorder %s733_s12, %s854_s0 }
  0x17   : > { %p538_p4 = pnand %p537_p3, %p536_p2  ;;  %p542_p8 = scmp.lt.u32.totalorder %s540_s26, %s535_s17 }
  0x18   : > { %p544_p9 = scmp.lt.u32.totalorder %s535_s17, %s733_s12 }
  0x19   : > { %p539_p7 = pneg %p538_p4  ;;  %p543_p10 = por %p542_p8, %p541_p5 }
  0x1b   : > { %p545_p0 = por %p544_p9, %p543_p10 }
  0x1d   : > { %p546_p1 = pnand %p545_p0, %p539_p7 }
  0x1f   : > { %549 = shalt.err (!%p546_p1)
}
  0x20   : > { %s550_s7 = scalar_lea.vmem %s741_s14, 128  ;;  %s633_s9 = smov [#allocation3]  }
  0x21   : > { %p551_p2 = scmp.ne.s32.totalorder %s741_s14, %s550_s7  ;;  %s555_s10 = sshll.u32 %s633_s9, 4  ;;  %s556_s10 = int_to_ptr.vmem [resolvable:$false] %s555_s10 }
  0x22   : > { %s557_s11 = scalar_lea.vmem %s556_s10, 256  ;;  %p558_p11 = scmp.lt.s32.totalorder %s741_s14, %s556_s10 }
  0x23   : > { %p553_p4 = pnand %p551_p2, %p537_p3  ;;  %p559_p5 = scmp.lt.s32.totalorder %s557_s11, %s550_s7 }
  0x25   : > { %p554_p12 = pneg %p553_p4  ;;  %p560_p8 = por %p559_p5, %p558_p11 }
  0x27   : > { %p561_p9 = pnand %p560_p8, %p554_p12 }
  0x29   : > { %564 = shalt.err (!%p561_p9)
}
  0x2a   : > { %487 = dma.hbm_to_vmem [thread:$0]  (!%p737_p13), %s733_s12, 128, %s741_s14, %s188_s16  }
  0x2b   : > { %p866_p0 = scmp.lt.s32.totalorder %s631_s21, 3  ;;  %p867_p1 = scmp.ge.s32.totalorder %s631_s21, 1 }
  0x2d   : > { %p204_p3 = pnand %p867_p1, %p866_p0 }
  0x2e   : > { %s775_s13 = sand.u32 (!%p204_p3), 1, %s623_s19  }
  0x2f   : > { %207 = sbr.rel (%p204_p3) target bundleno = 953 (0x3b9), region = 40  ;;  %s464_s17 = sshll.u32 (!%p204_p3), %s775_s13, 3 }
  0x30   : > { %s210_s23 = scalar_lea.sflag (!%p204_p3), [#allocation4], %s775_s13  ;;  %s213_s15 = scalar_lea.vmem (!%p204_p3), [#allocation3], %s464_s17 }
  0x36   : > { %610 = dma.done.wait (%p713_p6), %s210_s23, 128  }
  0x37   : > { %612 = vsyncadd (%p713_p6), %s210_s23, 4294967168  ;;  %v242_v0 = vld [vmem:[%s213_s15] sm:$0xff]  ;;  %s634_s12 = smov 112   ;;  %vm247_vm0 = vcmask 130048   ;;  %v466_v3 = vld [vmem:[%s857_s3] ss:$0 sm:$0xff] }
  0x38   : > { %244 = vrot.lane.b32.xlu0 %v242_v0, %s634_s12  ;;  %s635_s25 = smov 16   ;;  %v467_v10 = vld [vmem:[%s858_s4] ss:$0 sm:$0xff]  ;;  %v636_v14 = vmov 0.0   ;;  %vm637_vm1 = vmmov 0   ;;  %v638_v21 = vmov 0  }
  0x39   : > { %475 = vmatprep.subr.mxu0 %v636_v14  ;;  %477 = vmatprep.mubr.msk.f32.mxu0 %vm637_vm1, %v636_v14  ;;  %v291_v20 = vld [vmem:[%s856_s2] sm:$0xff]  ;;  %vm297_vm2 = vcmask 64512   ;;  %s470_s10 = sshll.u32 %s691_s22, 7  ;;  %s239_s11 = scalar_lea.vmem [#allocation6], %s464_s17 }
  0x3a   : > { %531 = vset.pattern.permute.xlu1 %v638_v21  ;;  %532 = vset.pattern.permute.xlu0 %v638_v21  ;;  %v289_v24 = vld [vmem:[%s855_s1] sm:$0xff]  ;;  %s388_s23 = sshll.u32 %s239_s11, 4  ;;  %s809_s14 = scalar_lea.hbm %s859_s5, %s470_s10  ;;  %s811_s23 = int_to_ptr.vmem [resolvable:$true] %s388_s23 }
  0x3b   : > { %s375_s16 = scalar_lea.sflag [#allocation5], %s775_s13  ;;  %s565_s22 = scalar_lea.vmem %s811_s23, 128 }
  0x3c   : > { %p566_p6 = scmp.ne.s32.totalorder %s811_s23, %s565_s22  ;;  %p868_p11 = scmp.ne.s32.totalorder %s863_s30, 0 }
  0x3d   : > { %s639_s17 = smov [#allocation6]  }
  0x3e   : > { %p567_p12 = pnand %p566_p6, %p868_p11 }
  0x40   : > { %p568_p13 = pneg %p567_p12 }
  0xaa   : > { %v245_v1 = vpop.permute.xlu0 %244 }
  0xab   : > { %v248_v2 = vsel %vm247_vm0, %v245_v1, 0.0 }
  0xac   : > { %249 = vadd.xlane.f32.xlu0 %v248_v2 }
  0xc2   : > { %271 = vrot.lane.b32.xlu0 %v466_v3, %s635_s25 }
 0x139   : > { %v250_v4 = vpop.xlane.xlu0 %249 }
 0x13a   : > { %v252_v5 = vmul.f32 0.0625, %v250_v4 }
 0x13c   : > { %v253_v6 = vsub.f32 %v242_v0, %v252_v5 }
 0x13d   : > { %v272_v16 = vpop.permute.xlu0 %271 }
 0x13e   : > { %v254_v7 = vmul.f32 %v253_v6, %v253_v6 }
 0x140   : > { %256 = vrot.lane.b32.xlu1 %v254_v7, %s634_s12 }
 0x1b2   : > { %v257_v8 = vpop.permute.xlu1 %256 }
 0x1b3   : > { %v259_v9 = vsel %vm247_vm0, %v257_v8, 0.0 }
 0x1b4   : > { %260 = vadd.xlane.f32.xlu1 %v259_v9 }
 0x1c5   : > { %280 = vrot.lane.b32.xlu1 %v467_v10, %s635_s25  ;;  %s569_s25 = sshll.u32 %s639_s17, 4  ;;  %s570_s25 = int_to_ptr.vmem [resolvable:$false] %s569_s25 }
 0x1c6   : > { %s571_s29 = scalar_lea.vmem %s570_s25, 256  ;;  %p572_p7 = scmp.lt.s32.totalorder %s811_s23, %s570_s25 }
 0x1c7   : > { %p573_p10 = scmp.lt.s32.totalorder %s571_s29, %s565_s22 }
 0x1c9   : > { %294 = vperm.xlu1 %531, %v291_v20   ;;  %p574_p2 = por %p573_p10, %p572_p7 }
 0x1cb   : > { %p575_p4 = pnand %p574_p2, %p568_p13 }
 0x241   : > { %v261_v11 = vpop.xlane.xlu1 %260 }
 0x242   : > { %v262_v12 = vmul.f32 0.0625, %v261_v11 }
 0x244   : > { %v263_v13 = vadd.f32 1e-05, %v262_v12 }
 0x245   : > { %v281_v18 = vpop.permute.xlu1 %280 }
 0x246   : > { %533 = vrsqrt.f32 %v263_v13 }
 0x249   : > { %v295_v26 = vpop.permute.xlu1 %294 }
 0x250   : > { %v534_v15 = vpop.eup %533 }
 0x251   : > { %v265_v17 = vmul.f32 %v534_v15, %v253_v6 }
 0x253   : > { %v274_v19 = vmul.f32 %v272_v16, %v265_v17 }
 0x255   : > { %v283_v22 = vadd.f32 %v281_v18, %v274_v19 }
 0x257   : > { %285 = vrot.lane.b32.xlu0 %v283_v22, %s634_s12 }
 0x2c9   : > { %v286_v23 = vpop.permute.xlu0 %285 }
 0x2ca   : > { %288 = vst.msk [vmem:[#allocation2] sm:$0xff] %vm247_vm0, %v286_v23 }
 0x2d1   : > { %v290_v25 = vld [vmem:[#allocation2] sm:$0xff] }
 0x2d2   : > { %476 = vmatpush3.msra.mxu0 %v290_v25 }
 0x2d3   : > { %478 = vmatmul.mubr.msk.f32.vlgmr.msra.gmra.mrb[0].mxu0 %vm297_vm2, %v289_v24 }
 0x3a6   : > { %v367_v27 = vpop.f32.mrb[0].mxu0 }
 0x3a7   : > { %v368_v28 = vadd.f32 %v367_v27, %v295_v26  ;;  %v479_v29 = vpop.f32.mrb[1].mxu0 }
 0x3a9   : > { %v372_v30 = vmul.f32 %v368_v28, %v242_v0 }
 0x3ab   : > { %373 = vst.msk [vmem:[%s239_s11] sm:$0xff] %vm247_vm0, %v372_v30 }
 0x3ac   : > { %578 = shalt.err (!%p575_p4)
}
 0x3ad   : > { %s579_s13 = scalar_lea.hbm %s809_s14, 128  ;;  %s583_s8 = scalar_lea.hbm %s859_s5, 256 }
 0x3ae   : > { %p580_p5 = scmp.ne.s32.totalorder %s809_s14, %s579_s13  ;;  %p584_p0 = scmp.lt.u32.totalorder %s809_s14, %s859_s5 }
 0x3af   : > { %p585_p1 = scmp.lt.u32.totalorder %s583_s8, %s579_s13  ;;  %p587_p6 = scmp.lt.u32.totalorder %s579_s13, %s809_s14 }
 0x3b0   : > { %p581_p8 = pnand %p580_p5, %p868_p11 }
 0x3b1   : > { %p586_p3 = por %p585_p1, %p584_p0 }
 0x3b2   : > { %p582_p9 = pneg %p581_p8 }
 0x3b3   : > { %p588_p12 = por %p587_p6, %p586_p3 }
 0x3b5   : > { %p589_p13 = pnand %p588_p12, %p582_p9 }
 0x3b7   : > { %592 = shalt.err (!%p589_p13)
}
 0x3b8   : > { %482 = dma.vmem_to_hbm [thread:$0]  (%p868_p11), %s811_s23, 128, %s809_s14, %s375_s16  }
 0x3b9 PF: > { %s400_s10 = sand.u32 1, %s619_s18   ;;  %p869_p7 = scmp.ne.s32.totalorder %s864_s6, 0 }
 0x3ba   : > { %p870_p10 = scmp.ge.s32.totalorder %s631_s21, 2  ;;  %s401_s11 = scalar_lea.sflag [#allocation5], %s400_s10 }
 0x3bc   : > { %p489_p2 = pnand %p870_p10, %p869_p7 }
 0x3be   : > { %614 = dma.done.wait (!%p489_p2), %s401_s11, 128  }
 0x3bf   : > { %616 = vsyncadd (!%p489_p2), %s401_s11, 4294967168  ;;  %p18_p4 = scmp.ge.s32.totalorder %s695_s24, 4   ;;  %s871_s18 = smov %s623_s19 }
 0x3c0   : > { %s872_s19 = smov %s627_s20  ;;  %s873_s20 = smov %s707_s27 }
 0x3c1   : > { %s874_s21 = smov %s695_s24  ;;  %20 = sbr.rel (!%p18_p4) target bundleno = 5 (0x5), region = 85 }
 0x3c8   :  { %406 = vsyncpa [#allocation4], 1 }
 0x3c9   :  { %408 = vsyncpa [#allocation4 + $0x1], 1 }
 0x3ca   :  { %409 = vsyncpa [#allocation5], 1 }
 0x3cb   :  { %411 = vsyncpa [#allocation5 + $0x1], 1 }

</bundles_post_ra>
